<compile_context>
chip_gen: v7x
topology: tpu7x:2x2x1
jax: 0.10.0
libtpu: 0.0.40
codegen_flags: <defaults>
</compile_context>

<pallas_src>
import jax
import jax.numpy as jnp
from jax.experimental import pallas as pl
from jax.experimental.pallas import tpu as pltpu


# ----------------------------------------------------------------------------
# Kernel: out[b, s, :] = pos[b, s] * x[b, s, :]   for a (Bb, S, H) tile.
# ----------------------------------------------------------------------------
def location_encoding_kernel(pos_ref, x_ref, out_ref):
    # pos_ref: [Bb, S, 1]   x_ref / out_ref: [Bb, S, H]
    # [Bb, S, 1] * [Bb, S, H] broadcasts the weight along the lane (H) axis.
    out_ref[...] = pos_ref[...] * x_ref[...]


# ----------------------------------------------------------------------------
# Wrapper
# ----------------------------------------------------------------------------
def _pick_block_b(B, S, H, itemsize):
    """Largest divisor of B whose (Bb, S, H) tile stays within a conservative
    per-buffer VMEM budget (double-buffered x + out) and gives <= ~1024 rows
    per grid step; falls back to the smallest feasible divisor."""
    budget = 4 * 1024 * 1024  # bytes per (x or out) buffer; x2 buffers x2 double-buffering ~ 16 MiB
    cands = [d for d in range(1, B + 1)
             if B % d == 0 and d * S * H * itemsize <= budget]
    if not cands:
        return 1
    good = [d for d in cands if d * S <= 1024]
    return max(good) if good else min(cands)


def location_encoding(x, pos_inx, block_b=None):
    B, S, H = x.shape
    if block_b is None:
        block_b = _pick_block_b(B, S, H, x.dtype.itemsize)
    assert B % block_b == 0, "block_b must divide the batch dimension"
    grid = (B // block_b,)

    # Trailing size-1 dim -> in-kernel lane broadcast; also removes any sublane
    # divisibility constraint on the pos block's leading (batch) dim.
    pos3 = pos_inx.reshape(B, S, 1).astype(x.dtype)

    return pl.pallas_call(
        location_encoding_kernel,
        out_shape=jax.ShapeDtypeStruct((B, S, H), x.dtype),
        grid=grid,
        in_specs=[
            pl.BlockSpec((block_b, S, 1), lambda b: (b, 0, 0)),   # pos_inx
            pl.BlockSpec((block_b, S, H), lambda b: (b, 0, 0)),   # x
        ],
        out_specs=pl.BlockSpec((block_b, S, H), lambda b: (b, 0, 0)),
        compiler_params=pltpu.CompilerParams(
            dimension_semantics=("parallel",)),   # shard batch steps across TCs (v7x)
    )(pos3, x)


if __name__ == "__main__":
    # Small shapes consistent with the module: batch=2, seq=8, hidden=32.
    B, S, H = 2, 8, 32

    key = jax.random.PRNGKey(0)
    kx, kp = jax.random.split(key)
    x = jax.random.normal(kx, (B, S, H), jnp.float32)
    pos_inx = jax.random.uniform(kp, (B, S), jnp.float32, minval=0.1, maxval=1.0)

    out = jax.jit(location_encoding)(x, pos_inx)
    jax.block_until_ready(out)

    ref = pos_inx[:, :, None] * x
    assert out.shape == (B, S, H) and out.dtype == jnp.float32
    assert jnp.allclose(out, ref, atol=1e-6, rtol=1e-6)
    print("KERNEL_OK")
</pallas_src>

<mosaic_0001>
module attributes {stable_mosaic.version = 11 : i64} {
  func.func @location_encoding_kernel(%arg0: i32, %arg1: memref<2x8x1xf32, #tpu.memory_space<vmem>>, %arg2: memref<2x8x32xf32, #tpu.memory_space<vmem>>, %arg3: memref<2x8x32xf32, #tpu.memory_space<vmem>>) attributes {dimension_semantics = [#tpu.dimension_semantics<parallel>], iteration_bounds = array<i64: 1>, scalar_prefetch = 0 : i64, scratch_operands = 0 : i64, tpu.core_type = #tpu.core_type<tc>, window_params = [{transform_indices = @transform_0, window_bounds = array<i64: 2, 8, 1>}, {transform_indices = @transform_1, window_bounds = array<i64: 2, 8, 32>}, {transform_indices = @transform_2, window_bounds = array<i64: 2, 8, 32>}]} {
    %c0 = arith.constant 0 : index
    %c0_0 = arith.constant 0 : index
    %c0_1 = arith.constant 0 : index
    %0 = vector.load %arg1[%c0, %c0_0, %c0_1] : memref<2x8x1xf32, #tpu.memory_space<vmem>>, vector<2x8x1xf32>
    %c0_2 = arith.constant 0 : index
    %c0_3 = arith.constant 0 : index
    %c0_4 = arith.constant 0 : index
    %1 = vector.load %arg2[%c0_2, %c0_3, %c0_4] : memref<2x8x32xf32, #tpu.memory_space<vmem>>, vector<2x8x32xf32>
    %2 = vector.broadcast %0 : vector<2x8x1xf32> to vector<2x8x32xf32>
    %3 = arith.mulf %2, %1 : vector<2x8x32xf32>
    %c0_5 = arith.constant 0 : index
    %c0_6 = arith.constant 0 : index
    %c0_7 = arith.constant 0 : index
    %4 = vector.load %arg3[%c0_5, %c0_6, %c0_7] : memref<2x8x32xf32, #tpu.memory_space<vmem>>, vector<2x8x32xf32>
    tpu.vector_store %arg3[%c0_5, %c0_6, %c0_7], %3 {strides = array<i32>} : memref<2x8x32xf32, #tpu.memory_space<vmem>>, vector<2x8x32xf32>,
    return
  }
  func.func @transform_0(%arg0: i32) -> (i32, i32, i32) {
    %c0_i32 = arith.constant 0 : i32
    %c0_i32_0 = arith.constant 0 : i32
    %c0_i32_1 = arith.constant 0 : i32
    return %arg0, %c0_i32, %c0_i32_0 : i32, i32, i32
  }
  func.func @transform_1(%arg0: i32) -> (i32, i32, i32) {
    %c0_i32 = arith.constant 0 : i32
    %c0_i32_0 = arith.constant 0 : i32
    %c0_i32_1 = arith.constant 0 : i32
    return %arg0, %c0_i32, %c0_i32_0 : i32, i32, i32
  }
  func.func @transform_2(%arg0: i32) -> (i32, i32, i32) {
    %c0_i32 = arith.constant 0 : i32
    %c0_i32_0 = arith.constant 0 : i32
    %c0_i32_1 = arith.constant 0 : i32
    return %arg0, %c0_i32, %c0_i32_0 : i32, i32, i32
  }
}

</mosaic_0001>

<bundles_post_ra>
// kernel: location_encoding.1
= control target key start
LH: loop header
LB: loop body
LE: loop exit
PB: predicated region body
PF: predicated region fallthrough
CT: control target
= control target key end

     0   :  { %v76_v1 = vmov 0   ;;  %s119_s0 = inlined_call_operand.vmem [shape: f32[2,8,1], index: 0, kind: input, shape index: {}]   ;;  %s120_s1 = inlined_call_operand.vmem [shape: f32[2,8,32], index: 1, kind: input, shape index: {}]   ;;  %s121_s2 = inlined_call_operand.hbm [shape: f32[2,8,32], index: 2, kind: output, shape index: {}]  }
   0x1   :  { %v12_v0 = vld [vmem:[%s119_s0] sm:$0xff]  ;;  %51 = vset.pattern.permute.xlu0 %v76_v1 }
   0x2   :  { %7 = vsyncpa [#allocation3], 0  ;;  %18 = vperm.xlu0 %51, %v12_v0   ;;  %v13_v2 = vld [vmem:[%s119_s0 + $0x8] sm:$0xff]  ;;  %v14_v3 = vld [vmem:[%s120_s1] sm:$0xff]  ;;  %vm28_vm0 = vcmask 261120   ;;  %s77_s15 = smov [#allocation2]  }
   0x3   :  { %s36_s16 = sshll.u32 %s77_s15, 4  ;;  %v15_v6 = vld [vmem:[%s120_s1 + $0x8] sm:$0xff]  ;;  %s37_s16 = int_to_ptr.vmem [resolvable:$true] %s36_s16 }
   0x4   :  { %s52_s0 = scalar_lea.vmem %s37_s16, 256  ;;  %p57_p1 = scmp.lt.s32.totalorder %s37_s16, %s37_s16 }
   0x5   :  { %p53_p0 = scmp.ne.s32.totalorder %s37_s16, %s52_s0  ;;  %p58_p2 = scmp.lt.s32.totalorder %s52_s0, %s52_s0 }
   0x6   :  { %23 = vperm.xlu0 %51, %v13_v2  }
   0x7   :  { %p59_p3 = por %p58_p2, %p57_p1 }
   0x9   :  { %p60_p4 = pnand %p59_p3, %p53_p0 }
  0x81   :  { %v19_v4 = vpop.permute.xlu0 %18 }
  0x82   :  { %v26_v5 = vmul.f32 %v19_v4, %v14_v3 }
  0x84   :  { %29 = vst.msk [vmem:[#allocation2] sm:$0xff] %vm28_vm0, %v26_v5 }
  0x85   :  { %v24_v7 = vpop.permute.xlu0 %23 }
  0x86   :  { %v27_v8 = vmul.f32 %v24_v7, %v15_v6 }
  0x88   :  { %30 = vst.msk [vmem:[#allocation2 + $0x8] sm:$0xff] %vm28_vm0, %v27_v8 }
  0x89   :  { %63 = shalt.err (!%p60_p4)
}
  0x8a   :  { %s64_s21 = scalar_lea.hbm %s121_s2, 256 }
  0x8b   :  { %p65_p5 = scmp.ne.s32.totalorder %s121_s2, %s64_s21  ;;  %p68_p6 = scmp.lt.u32.totalorder %s64_s21, %s121_s2 }
  0x8d   :  { %p70_p7 = pnand %p68_p6, %p65_p5 }
  0x8f   :  { %73 = shalt.err (!%p70_p7)
}
  0x90   :  { %s78_s25 = smov 128   ;;  %s79_s26 = smov 8  }
  0x91   :  { %42 = dma.vmem_to_hbm [thread:$0]  %s37_s16, 256, %s121_s2, [#allocation3], %s78_s25, %s78_s25, %s79_s26  }
  0x92   :  { %74 = dma.done.wait [#allocation3], 256  }
  0x93   :  { %75 = vsyncadd [#allocation3], 4294967040 }
  0x94   :  { %46 = vsyncpa [#allocation3], 1 }

</bundles_post_ra>
